<compile_context>
chip_gen: v7x
topology: tpu7x:2x2x1
jax: 0.10.0
libtpu: 0.0.40
codegen_flags: <defaults>
</compile_context>

<pallas_src>
import numpy as np
import jax
import jax.numpy as jnp
from jax.experimental import pallas as pl
from jax.experimental.pallas import tpu as pltpu

OUT_CH = 256
BN_EPS = 1e-5
# ~2 MiB f32 per block: safe for v7x (64 MiB VMEM), large enough for v5e/v6e to
# amortize the ~0.35us per-grid-step overhead.  (Raise for v6e-only builds.)
MAX_BLOCK_ELEMS = 512 * 1024

_COMPILER_PARAMS = pltpu.CompilerParams(
    dimension_semantics=("parallel", "parallel"),
    vmem_limit_bytes=48 * 1024 * 1024,
)


# ---------------------------------------------------------------------------
# Pallas kernels
# ---------------------------------------------------------------------------
def _conv_bn_relu_kernel(x_ref, w_ref, s_ref, b_ref, o_ref):
    # x: (1, TP, Cin) bf16   w: (Cin, C) bf16   s/b: (1, C) f32   o: (1, TP, C) f32
    acc = jnp.dot(x_ref[0], w_ref[...], preferred_element_type=jnp.float32)
    o_ref[0] = jnp.maximum(acc * s_ref[...] + b_ref[...], 0.0)


def _upsample_rows_kernel(rh_ref, xc_ref, o_ref):
    # Height pass of the separable bilinear upsample.
    # rh: (TR, Hin) f32   xc: (1, Hin, Win*C) f32   o: (1, TR, Win*C) f32
    o_ref[0] = jnp.dot(rh_ref[...], xc_ref[0], preferred_element_type=jnp.float32)


def _fused_width_conv_kernel(rw_ref, hu_ref, xf_ref, w_ref, s_ref, b_ref, o_ref):
    # Width pass of the upsample, fused with conv1x1+BN+ReLU of the fine level.
    # rw: (Wout, Win) f32           hu: (1, TH, Win, C) f32
    # xf: (1, TH*Wout, Cin) bf16    w: (Cin, C) bf16   s/b: (1, C) f32
    # o : (1, TH*Wout, C) f32
    conv = jnp.dot(xf_ref[0], w_ref[...], preferred_element_type=jnp.float32)
    conv = jnp.maximum(conv * s_ref[...] + b_ref[...], 0.0)
    th = hu_ref.shape[1]
    wout = rw_ref.shape[0]
    for r in range(th):  # static unroll over the row-tile's rows
        up = jnp.dot(rw_ref[...], hu_ref[0, r], preferred_element_type=jnp.float32)
        o_ref[0, r * wout:(r + 1) * wout, :] = up + conv[r * wout:(r + 1) * wout, :]


def _upsample_cols_kernel(rw_ref, hu_ref, o_ref):
    # Width pass only (used for same_size_output's final upsample1).
    th = hu_ref.shape[1]
    wout = rw_ref.shape[0]
    for r in range(th):
        o_ref[0, r * wout:(r + 1) * wout, :] = jnp.dot(
            rw_ref[...], hu_ref[0, r], preferred_element_type=jnp.float32)


# ---------------------------------------------------------------------------
# Wrappers around pallas_call
# ---------------------------------------------------------------------------
def _largest_divisor(total, pred):
    for d in range(total, 0, -1):
        if total % d == 0 and pred(d):
            return d
    return total


def conv_bn_relu(x_pix, w_t, scale, shift):
    """x_pix: (N, P, Cin) bf16 -> (N, P, Cout) f32, tiled over the pixel axis."""
    N, P, Cin = x_pix.shape
    Cout = w_t.shape[1]
    tp = _largest_divisor(
        P, lambda d: d * max(Cin, Cout) <= MAX_BLOCK_ELEMS and (d % 8 == 0 or d == P))
    return pl.pallas_call(
        _conv_bn_relu_kernel,
        out_shape=jax.ShapeDtypeStruct((N, P, Cout), jnp.float32),
        grid=(N, P // tp),
        in_specs=[
            pl.BlockSpec((1, tp, Cin), lambda b, t: (b, t, 0)),
            pl.BlockSpec((Cin, Cout), lambda b, t: (0, 0)),
            pl.BlockSpec((1, Cout), lambda b, t: (0, 0)),
            pl.BlockSpec((1, Cout), lambda b, t: (0, 0)),
        ],
        out_specs=pl.BlockSpec((1, tp, Cout), lambda b, t: (b, t, 0)),
        compiler_params=_COMPILER_PARAMS,
    )(x_pix, w_t, scale.reshape(1, Cout), shift.reshape(1, Cout))


def upsample_rows(coarse, rh):
    """Height pass.  coarse: (N, Hin, Win*C) f32, rh: (Hout, Hin) -> (N, Hout, Win*C)."""
    N, Hin, WC = coarse.shape
    Hout = rh.shape[0]
    tr = _largest_divisor(
        Hout, lambda d: d * WC <= MAX_BLOCK_ELEMS and (d % 8 == 0 or d == Hout))
    return pl.pallas_call(
        _upsample_rows_kernel,
        out_shape=jax.ShapeDtypeStruct((N, Hout, WC), jnp.float32),
        grid=(N, Hout // tr),
        in_specs=[
            pl.BlockSpec((tr, Hin), lambda b, t: (t, 0)),
            pl.BlockSpec((1, Hin, WC), lambda b, t: (b, 0, 0)),
        ],
        out_specs=pl.BlockSpec((1, tr, WC), lambda b, t: (b, t, 0)),
        compiler_params=_COMPILER_PARAMS,
    )(rh, coarse)


def fused_width_conv(hu, rw, x_fine, w_t, scale, shift):
    """(width pass of the upsample) + conv_bn_relu(fine level), tiled over rows.

    hu:     (N, Hout, Win, C) f32      height-upsampled coarse map
    rw:     (Wout, Win)       f32
    x_fine: (N, Hout*Wout, Cin) bf16
    -> (N, Hout*Wout, C) f32
    """
    N, Hout, Win, C = hu.shape
    Wout = rw.shape[0]
    _, Pf, Cin = x_fine.shape
    assert Pf == Hout * Wout
    th = _largest_divisor(
        Hout,
        lambda d: (d * Wout * max(Cin, C) <= MAX_BLOCK_ELEMS
                   and d * Win * C <= MAX_BLOCK_ELEMS
                   and ((d * Wout) % 8 == 0 or d == Hout)))
    return pl.pallas_call(
        _fused_width_conv_kernel,
        out_shape=jax.ShapeDtypeStruct((N, Pf, C), jnp.float32),
        grid=(N, Hout // th),
        in_specs=[
            pl.BlockSpec((Wout, Win), lambda b, t: (0, 0)),
            pl.BlockSpec((1, th, Win, C), lambda b, t: (b, t, 0, 0)),
            pl.BlockSpec((1, th * Wout, Cin), lambda b, t: (b, t, 0)),
            pl.BlockSpec((Cin, C), lambda b, t: (0, 0)),
            pl.BlockSpec((1, C), lambda b, t: (0, 0)),
            pl.BlockSpec((1, C), lambda b, t: (0, 0)),
        ],
        out_specs=pl.BlockSpec((1, th * Wout, C), lambda b, t: (b, t, 0)),
        compiler_params=_COMPILER_PARAMS,
    )(rw, hu, x_fine, w_t, scale.reshape(1, C), shift.reshape(1, C))


def upsample_cols(hu, rw):
    """Width pass only: hu (N, Hout, Win, C) f32 -> (N, Hout*Wout, C) f32."""
    N, Hout, Win, C = hu.shape
    Wout = rw.shape[0]
    th = _largest_divisor(
        Hout,
        lambda d: (d * Wout * C <= MAX_BLOCK_ELEMS
                   and d * Win * C <= MAX_BLOCK_ELEMS
                   and ((d * Wout) % 8 == 0 or d == Hout)))
    return pl.pallas_call(
        _upsample_cols_kernel,
        out_shape=jax.ShapeDtypeStruct((N, Hout * Wout, C), jnp.float32),
        grid=(N, Hout // th),
        in_specs=[
            pl.BlockSpec((Wout, Win), lambda b, t: (0, 0)),
            pl.BlockSpec((1, th, Win, C), lambda b, t: (b, t, 0, 0)),
        ],
        out_specs=pl.BlockSpec((1, th * Wout, C), lambda b, t: (b, t, 0)),
        compiler_params=_COMPILER_PARAMS,
    )(rw, hu)


# ---------------------------------------------------------------------------
# 1-D bilinear interpolation matrix (align_corners=True, matches nn.Upsample)
# ---------------------------------------------------------------------------
def bilinear_matrix(out_size, in_size):
    R = np.zeros((out_size, in_size), np.float32)
    if out_size == 1 or in_size == 1:
        R[:, 0] = 1.0
        return R
    for o in range(out_size):
        s = o * (in_size - 1) / (out_size - 1)
        i0 = int(np.floor(s))
        i1 = min(i0 + 1, in_size - 1)
        w1 = s - i0
        R[o, i0] += 1.0 - w1
        R[o, i1] += w1
    return R


# ---------------------------------------------------------------------------
# FPNHead in JAX + Pallas
# ---------------------------------------------------------------------------
class FPNHeadPallas:
    def __init__(self, size, same_size_output=False, key=None):
        if key is None:
            key = jax.random.PRNGKey(0)
        self.size = size                      # [s0, s1, s2, s3], s0 largest
        self.same_size_output = same_size_output
        in_chs = {"block4": 512, "block3": 256, "block2": 128, "block1": 64}
        self.params = {}
        for name, cin in in_chs.items():
            key, k1, k2, k3, k4, k5, k6 = jax.random.split(key, 7)
            w = 0.05 * jax.random.normal(k1, (cin, OUT_CH), jnp.float32)
            conv_b = 0.05 * jax.random.normal(k2, (OUT_CH,), jnp.float32)
            gamma = 1.0 + 0.1 * jax.random.normal(k3, (OUT_CH,), jnp.float32)
            beta = 0.05 * jax.random.normal(k4, (OUT_CH,), jnp.float32)
            rmean = 0.02 * jax.random.normal(k5, (OUT_CH,), jnp.float32)
            rvar = jax.random.uniform(k6, (OUT_CH,), jnp.float32, 0.5, 1.5)
            inv_std = 1.0 / jnp.sqrt(rvar + BN_EPS)
            scale = gamma * inv_std
            shift = (conv_b - rmean) * scale + beta
            # bf16 weights feed the MXU; folded scale/shift stay f32 (epilogue).
            self.params[name] = (w.astype(jnp.bfloat16), scale, shift)
        self._interp_cache = {}

    def _interp(self, out_size, in_size):
        k = (int(out_size), int(in_size))
        if k not in self._interp_cache:
            self._interp_cache[k] = jnp.asarray(bilinear_matrix(*k))
        return self._interp_cache[k]

    def _fpn_level(self, c_pix, s_in, s_out, fine_pix, w_t, scale, shift):
        n = c_pix.shape[0]
        r = self._interp(s_out, s_in)
        coarse = c_pix.reshape(n, s_in, s_in * OUT_CH)            # free reshape
        hu = upsample_rows(coarse, r)                             # (n, s_out, s_in*C)
        hu = hu.reshape(n, s_out, s_in, OUT_CH)                   # free reshape
        return fused_width_conv(hu, r, fine_pix, w_t, scale, shift)

    def _upsample(self, c_pix, s_in, s_out):
        n = c_pix.shape[0]
        r = self._interp(s_out, s_in)
        coarse = c_pix.reshape(n, s_in, s_in * OUT_CH)
        hu = upsample_rows(coarse, r).reshape(n, s_out, s_in, OUT_CH)
        return upsample_cols(hu, r)

    def __call__(self, features):
        # features: list of 4 NCHW arrays; features[3] is the coarsest level.
        n = features[0].shape[0]

        def to_pix(x):
            _, c, h, w = x.shape
            p = jnp.transpose(x, (0, 2, 3, 1)).reshape(n, h * w, c)
            return p.astype(jnp.bfloat16), h

        pix, sp = [], []
        for f in features:
            p, h = to_pix(f)
            pix.append(p)
            sp.append(h)

        s = self.size
        targets = [s[3], s[2], s[1]] if self.same_size_output else [s[2], s[1], s[0]]

        c = conv_bn_relu(pix[3], *self.params["block4"])          # (n, sp3^2, 256)
        cur = sp[3]
        for tgt, name, fi in zip(targets, ("block3", "block2", "block1"), (2, 1, 0)):
            assert tgt == sp[fi], "upsample target must match fine feature size"
            c = self._fpn_level(c, cur, tgt, pix[fi], *self.params[name])
            cur = tgt
        if self.same_size_output:
            c = self._upsample(c, cur, s[0])
            cur = s[0]

        out = c.reshape(n, cur, cur, OUT_CH)
        return jnp.transpose(out, (0, 3, 1, 2))                   # NCHW


# ---------------------------------------------------------------------------
# Pure-JAX reference mirroring the kernel math (bf16 conv GEMMs, f32 epilogue,
# separable f32 bilinear upsample), for verification.
# ---------------------------------------------------------------------------
def reference_forward(features, params, size, same_size_output=False):
    def conv(x, w_bf16, scale, shift):
        xp = jnp.transpose(x, (0, 2, 3, 1)).astype(jnp.bfloat16)  # NHWC bf16
        y = jnp.einsum("nhwc,cd->nhwd", xp, w_bf16,
                       preferred_element_type=jnp.float32)
        return jnp.maximum(y * scale + shift, 0.0)

    def up(x, out_s):
        in_s = x.shape[1]
        r = jnp.asarray(bilinear_matrix(out_s, in_s))
        y = jnp.einsum("oh,nhwc->nowc", r, x)
        return jnp.einsum("ow,nhwc->nhoc", r, y)

    s = size
    t = [s[3], s[2], s[1]] if same_size_output else [s[2], s[1], s[0]]
    c4 = conv(features[3], *params["block4"])
    c3 = up(c4, t[0]) + conv(features[2], *params["block3"])
    c2 = up(c3, t[1]) + conv(features[1], *params["block2"])
    c1 = up(c2, t[2]) + conv(features[0], *params["block1"])
    if same_size_output:
        c1 = up(c1, s[0])
    return jnp.transpose(c1, (0, 3, 1, 2))                        # NCHW


if __name__ == "__main__":
    key = jax.random.PRNGKey(0)
    size = [16, 8, 4, 2]          # spatial sizes, largest -> smallest
    chans = [64, 128, 256, 512]   # per-level input channels fixed by the module
    N = 2

    keys = jax.random.split(key, 5)
    features = [
        jax.random.normal(keys[i], (N, chans[i], size[i], size[i]), jnp.float32)
        for i in range(4)
    ]

    model = FPNHeadPallas(size, same_size_output=False, key=keys[4])
    out = jax.block_until_ready(model(features))

    assert out.shape == (N, OUT_CH, size[0], size[0])
    ref = jax.block_until_ready(
        reference_forward(features, model.params, size, same_size_output=False))
    # bf16 MXU inputs + f32 accumulation -> allow a small numerical tolerance.
    np.testing.assert_allclose(np.asarray(out), np.asarray(ref), rtol=1e-2, atol=1e-2)
    print("KERNEL_OK")
</pallas_src>

<mosaic_0001>
module attributes {stable_mosaic.version = 11 : i64} {
  func.func @_conv_bn_relu_kernel(%arg0: i32, %arg1: i32, %arg2: memref<1x4x512xbf16, #tpu.memory_space<vmem>>, %arg3: memref<512x256xbf16, #tpu.memory_space<vmem>>, %arg4: memref<1x256xf32, #tpu.memory_space<vmem>>, %arg5: memref<1x256xf32, #tpu.memory_space<vmem>>, %arg6: memref<1x4x256xf32, #tpu.memory_space<vmem>>) attributes {dimension_semantics = [#tpu.dimension_semantics<parallel>, #tpu.dimension_semantics<parallel>], iteration_bounds = array<i64: 2, 1>, scalar_prefetch = 0 : i64, scratch_operands = 0 : i64, tpu.core_type = #tpu.core_type<tc>, window_params = [{transform_indices = @transform_0, window_bounds = array<i64: 1, 4, 512>}, {pipeline_mode = #tpu.pipeline_mode<synchronous>, transform_indices = @transform_1, window_bounds = array<i64: 512, 256>}, {pipeline_mode = #tpu.pipeline_mode<synchronous>, transform_indices = @transform_2, window_bounds = array<i64: 1, 256>}, {pipeline_mode = #tpu.pipeline_mode<synchronous>, transform_indices = @transform_3, window_bounds = array<i64: 1, 256>}, {transform_indices = @transform_4, window_bounds = array<i64: 1, 4, 256>}]} {
    %c0 = arith.constant 0 : index
    %c0_0 = arith.constant 0 : index
    %c0_1 = arith.constant 0 : index
    %0 = vector.load %arg2[%c0, %c0_0, %c0_1] : memref<1x4x512xbf16, #tpu.memory_space<vmem>>, vector<1x4x512xbf16>
    %1 = vector.shape_cast %0 : vector<1x4x512xbf16> to vector<4x512xbf16>
    %c0_2 = arith.constant 0 : index
    %c0_3 = arith.constant 0 : index
    %2 = vector.load %arg3[%c0_2, %c0_3] : memref<512x256xbf16, #tpu.memory_space<vmem>>, vector<512x256xbf16>
    %cst = arith.constant dense<0.000000e+00> : vector<4x256xf32>
    %3 = tpu.matmul %1, %2, %cst {dimension_numbers = #tpu.dot_dimension_numbers<[1], [0], [0], [1], [0, 0, 1, 1], [], []>} : vector<4x512xbf16>, vector<512x256xbf16>, vector<4x256xf32> -> vector<4x256xf32>
    %c0_4 = arith.constant 0 : index
    %c0_5 = arith.constant 0 : index
    %4 = vector.load %arg4[%c0_4, %c0_5] : memref<1x256xf32, #tpu.memory_space<vmem>>, vector<1x256xf32>
    %5 = vector.broadcast %4 : vector<1x256xf32> to vector<4x256xf32>
    %6 = arith.mulf %3, %5 : vector<4x256xf32>
    %c0_6 = arith.constant 0 : index
    %c0_7 = arith.constant 0 : index
    %7 = vector.load %arg5[%c0_6, %c0_7] : memref<1x256xf32, #tpu.memory_space<vmem>>, vector<1x256xf32>
    %8 = vector.broadcast %7 : vector<1x256xf32> to vector<4x256xf32>
    %9 = arith.addf %6, %8 : vector<4x256xf32>
    %cst_8 = arith.constant 0.000000e+00 : f32
    %10 = vector.broadcast %cst_8 : f32 to vector<4x256xf32>
    %11 = arith.maximumf %9, %10 : vector<4x256xf32>
    %c0_9 = arith.constant 0 : index
    %c0_10 = arith.constant 0 : index
    %c0_11 = arith.constant 0 : index
    %12 = vector.load %arg6[%c0_9, %c0_10, %c0_11] : memref<1x4x256xf32, #tpu.memory_space<vmem>>, vector<1x4x256xf32>
    %13 = vector.shape_cast %12 : vector<1x4x256xf32> to vector<4x256xf32>
    %14 = vector.shape_cast %11 : vector<4x256xf32> to vector<1x4x256xf32>
    tpu.vector_store %arg6[%c0_9, %c0_10, %c0_11], %14 {strides = array<i32>} : memref<1x4x256xf32, #tpu.memory_space<vmem>>, vector<1x4x256xf32>,
    return
  }
  func.func @transform_0(%arg0: i32, %arg1: i32) -> (i32, i32, i32) {
    %c0_i32 = arith.constant 0 : i32
    %c0_i32_0 = arith.constant 0 : i32
    return %arg0, %arg1, %c0_i32 : i32, i32, i32
  }
  func.func @transform_1(%arg0: i32, %arg1: i32) -> (i32, i32) {
    %c0_i32 = arith.constant 0 : i32
    %c0_i32_0 = arith.constant 0 : i32
    %c0_i32_1 = arith.constant 0 : i32
    return %c0_i32, %c0_i32_0 : i32, i32
  }
  func.func @transform_2(%arg0: i32, %arg1: i32) -> (i32, i32) {
    %c0_i32 = arith.constant 0 : i32
    %c0_i32_0 = arith.constant 0 : i32
    %c0_i32_1 = arith.constant 0 : i32
    return %c0_i32, %c0_i32_0 : i32, i32
  }
  func.func @transform_3(%arg0: i32, %arg1: i32) -> (i32, i32) {
    %c0_i32 = arith.constant 0 : i32
    %c0_i32_0 = arith.constant 0 : i32
    %c0_i32_1 = arith.constant 0 : i32
    return %c0_i32, %c0_i32_0 : i32, i32
  }
  func.func @transform_4(%arg0: i32, %arg1: i32) -> (i32, i32, i32) {
    %c0_i32 = arith.constant 0 : i32
    %c0_i32_0 = arith.constant 0 : i32
    return %arg0, %arg1, %c0_i32 : i32, i32, i32
  }
}

</mosaic_0001>

<bundles_post_ra>
// kernel: tpu_custom_call.1
= control target key start
LH: loop header
LB: loop body
LE: loop exit
PB: predicated region body
PF: predicated region fallthrough
CT: control target
= control target key end

     0   :  { %9 = vsyncpa [#allocation3], 0  ;;  %s1549_s0 = inlined_call_operand.hbm [shape: bf16[2,4,512], index: 0, kind: input, shape index: {}]   ;;  %s1550_s1 = inlined_call_operand.hbm [shape: bf16[512,256], index: 1, kind: input, shape index: {}]   ;;  %s1551_s2 = inlined_call_operand.vmem [shape: f32[1,256], index: 2, kind: input, shape index: {}]   ;;  %s1552_s3 = inlined_call_operand.vmem [shape: f32[1,256], index: 3, kind: input, shape index: {}]   ;;  %s1553_s4 = inlined_call_operand.hbm [shape: f32[2,4,256], index: 4, kind: output, shape index: {}]  }
   0x1   :  { %11 = vsyncpa [#allocation3 + $0x1], 0 }
   0x2   :  { %12 = vsyncpa [#allocation6], 0 }
   0x3   :  { %13 = vsyncpa [#allocation4], 0 }
   0x4   :  { %15 = vsyncpa [#allocation4 + $0x1], 0  ;;  %s1317_s15 = smov 0   ;;  %s1319_s16 = smov 0  }
   0x5   :  { %s1321_s17 = smov 0   ;;  %s1323_s18 = smov 0  }
   0x6   :  { %s1325_s19 = smov 0   ;;  %s1327_s20 = smov 0  }
   0x7 LB: > { %s882_s21 = sadd.s32 4294967295, %s1284_s20   ;;  %s883_s22 = sadd.s32 4294967294, %s1284_s20   ;;  %s1284_s20 = sphi %s1327_s20, %s21_s20   ;;  %s1280_s19 = sphi %s1325_s19, %s1577_s19   ;;  %s1276_s18 = sphi %s1323_s18, %s1576_s18   ;;  %s1272_s17 = sphi %s1321_s17, %s1575_s17   ;;  %s1268_s16 = sphi %s1319_s16, %s1574_s16   ;;  %s1264_s15 = sphi %s1317_s15, %s1573_s15  }
   0x8   : > { %p55_p0 = scmp.ne.s32.totalorder %s1268_s16, %s1264_s15  ;;  %p1351_p1 = scmp.eq.s32.totalorder %s882_s21, 0 }
   0x9   : > { %p1355_p2 = scmp.eq.s32.totalorder %s882_s21, 1  ;;  %p150_p3 = scmp.eq.s32.totalorder %s883_s22, 1 }
   0xa   : > { %s1558_s23 = scalar_select %p1351_p1, 1, 0 }
   0xb   : > { %s1559_s24 = scalar_select %p1355_p2, 1, 0 }
   0xc   : > { %p1361_p4 = por %p1351_p1, %p55_p0  ;;  %p884_p5 = scmp.ge.s32.totalorder %s1284_s20, 1 }
   0xd   : > { %p1366_p6 = por %p150_p3, %p55_p0  ;;  %p157_p7 = scmp.lt.s32.totalorder %s1284_s20, 3 }
   0xe   : > { %s1560_s25 = scalar_select %p1361_p4, 1, 0 }
   0xf   : > { %s1561_s26 = scalar_select %p1366_p6, 1, 0 }
  0x10   : > { %p1371_p8 = pnand %p884_p5, %p157_p7  ;;  %s1286_s28 = smov [#allocation5]  }
  0x11   : > { %s169_s29 = sshll.u32 %s1286_s28, 4  ;;  %s33_s5 = sadd.s32 1, %s1280_s19  ;;  %s170_s29 = int_to_ptr.vmem [resolvable:$true] %s169_s29 }
  0x12   : > { %s1562_s27 = scalar_select %p1371_p8, 1, 0 }
  0x13   : > { %p975_p9 = pneg %p1371_p8  ;;  %s1140_s8 = scalar_lea.hbm %s1550_s1, 8192 }
  0x14   : > { %p1141_p12 = scmp.ne.s32.totalorder %s1550_s1, %s1140_s8  ;;  %p1147_p5 = scmp.lt.u32.totalorder %s1140_s8, %s1550_s1 }
  0x15   : > { %p1380_p11 = pnand %p975_p9, %p1351_p1 }
  0x17   : > { %p1142_p13 = pneg %p1380_p11 }
  0x19   : > { %p1143_p0 = pnand %p1142_p13, %p1141_p12 }
  0x1b   : > { %p1144_p3 = pneg %p1143_p0 }
  0x1d   : > { %p1149_p7 = pnand %p1147_p5, %p1144_p3 }
  0x1f   : > { %1152 = shalt.err (!%p1149_p7)
}
  0x20   : > { %s1153_s13 = scalar_lea.vmem %s170_s29, 8192  ;;  %p1161_p1 = scmp.lt.s32.totalorder %s170_s29, %s170_s29 }
  0x21   : > { %p1154_p9 = scmp.ne.s32.totalorder %s170_s29, %s1153_s13  ;;  %p1162_p4 = scmp.lt.s32.totalorder %s1153_s13, %s1153_s13 }
  0x23   : > { %p1156_p10 = pnand %p1154_p9, %p1142_p13  ;;  %p1163_p8 = por %p1162_p4, %p1161_p1 }
  0x25   : > { %p1157_p6 = pneg %p1156_p10 }
  0x27   : > { %p1164_p2 = pnand %p1163_p8, %p1157_p6 }
  0x29   : > { %1167 = shalt.err (!%p1164_p2)
}
  0x2a   : > { %s1287_s14 = smov 128   ;;  %s1288_s21 = smov 8  }
  0x2b   : > { %978 = dma.hbm_to_vmem [thread:$0]  (!%p1380_p11), %s1550_s1, 8192, %s170_s29, [#allocation6], %s1287_s14, %s1287_s14, %s1288_s21  }
  0x2c   : > { %p35_p1 = scmp.ge.s32.totalorder %s33_s5, 2  ;;  %s42_s6 = sadd.s32 1, %s1272_s17 }
  0x2d   : > { %p49_p2 = scmp.ne.s32.totalorder %s1272_s17, %s1268_s16  ;;  %p50_p4 = scmp.eq.s32.totalorder %s1284_s20, 0 }
  0x2e   : > { %s1579_s5 = smov (%p35_p1, %s33_s5), 0  ;;  %p1565_p8 = scmp.ne.s32.totalorder %s1559_s24, 0 }
  0x2f   : > { %p1407_p6 = por %p50_p4, %p49_p2  ;;  %s37_s30 = ssub.s32 %s1280_s19, %s1579_s5 }
  0x30   : > { %p1413_p10 = por %p1565_p8, %p49_p2  ;;  %p988_p12 = scmp.lt.s32.totalorder %s1284_s20, 2 }
  0x31   : > { %p40_p11 = scmp.eq.s32.totalorder %s37_s30, 0  ;;  %s189_s29 = sand.u32 1, %s1272_s17  }
  0x32   : > { %s887_s9 = sshll.u32 %s189_s29, 3  ;;  %s963_s11 = sshll.u32 %s1280_s19, 7 }
  0x33   : > { %s1422_s10 = scalar_select %p40_p11, %s1272_s17, %s42_s6  }
  0x34   : > { %s1428_s14 = scalar_lea.hbm %s1549_s0, %s963_s11  ;;  %s193_s24 = scalar_lea.vmem [#allocation2], %s887_s9 }
  0x35   : > { %s203_s21 = sshll.u32 %s193_s24, 4  ;;  %p1434_p13 = pnand %p988_p12, %p1407_p6  ;;  %s1430_s21 = int_to_ptr.vmem [resolvable:$true] %s203_s21 }
  0x36   : > { %s190_s28 = scalar_lea.sflag [#allocation3], %s189_s29  ;;  %s1168_s6 = scalar_lea.hbm %s1428_s14, 128 }
  0x37   : > { %p1169_p0 = scmp.ne.s32.totalorder %s1428_s14, %s1168_s6  ;;  %p1170_p3 = pneg %p1434_p13 }
  0x38   : > { %s1173_s11 = scalar_lea.hbm %s1549_s0, 256  ;;  %p1174_p9 = scmp.lt.u32.totalorder %s1428_s14, %s1549_s0 }
  0x39   : > { %p1171_p5 = pnand %p1170_p3, %p1169_p0  ;;  %p1175_p1 = scmp.lt.u32.totalorder %s1173_s11, %s1168_s6 }
  0x3a   : > { %p1177_p4 = scmp.lt.u32.totalorder %s1168_s6, %s1428_s14 }
  0x3b   : > { %p1172_p7 = pneg %p1171_p5  ;;  %p1176_p2 = por %p1175_p1, %p1174_p9 }
  0x3d   : > { %p1178_p6 = por %p1177_p4, %p1176_p2 }
  0x3f   : > { %p1179_p8 = pnand %p1178_p6, %p1172_p7 }
  0x41   : > { %1182 = shalt.err (!%p1179_p8)
}
  0x42   : > { %s1183_s29 = scalar_lea.vmem %s1430_s21, 128  ;;  %s1289_s13 = smov [#allocation2]  }
  0x43   : > { %p1184_p12 = scmp.ne.s32.totalorder %s1430_s21, %s1183_s29  ;;  %s1188_s24 = sshll.u32 %s1289_s13, 4  ;;  %s1189_s24 = int_to_ptr.vmem [resolvable:$false] %s1188_s24 }
  0x44   : > { %s1190_s30 = scalar_lea.vmem %s1189_s24, 256  ;;  %p1191_p5 = scmp.lt.s32.totalorder %s1430_s21, %s1189_s24 }
  0x45   : > { %p1186_p11 = pnand %p1184_p12, %p1170_p3  ;;  %p1192_p9 = scmp.lt.s32.totalorder %s1190_s30, %s1183_s29 }
  0x47   : > { %p1187_p0 = pneg %p1186_p11  ;;  %p1193_p1 = por %p1192_p9, %p1191_p5 }
  0x49   : > { %p1194_p2 = pnand %p1193_p1, %p1187_p0 }
  0x4b   : > { %1197 = shalt.err (!%p1194_p2)
}
  0x4c   : > { %982 = dma.hbm_to_vmem [thread:$0]  (!%p1434_p13), %s1428_s14, 128, %s1430_s21, %s190_s28  }
  0x4d   : > { %p1568_p7 = scmp.ne.s32.totalorder %s1562_s27, 0 }
  0x4e   : > { %s1466_s6 = sand.u32 (!%p1568_p7), 1, %s1268_s16   ;;  %p1569_p3 = scmp.ne.s32.totalorder (!%p1568_p7), %s1560_s25, 0 }
  0x4f   : > { %212 = sbr.rel (%p1568_p7) target bundleno = 393 (0x189), region = 36  ;;  %s891_s9 = sshll.u32 (!%p1568_p7), %s1466_s6, 3 }
  0x50   : > { %s215_s11 = scalar_lea.sflag (!%p1568_p7), [#allocation3], %s1466_s6  ;;  %s1472_s7 = scalar_lea.vmem (!%p1568_p7), [#allocation2], %s891_s9 }
  0x56   : > { %1251 = dma.done.wait (%p1569_p3), %s215_s11, 128  }
  0x57   : > { %1253 = vsyncadd (%p1569_p3), %s215_s11, 4294967168  ;;  %p1570_p13 = scmp.ne.s32.totalorder %s1558_s23, 0 }
  0x59   : > { %1255 = dma.done.wait (%p1570_p13), [#allocation6], 8192  }
  0x5a   : > { %1257 = vsyncadd (%p1570_p13), [#allocation6], 4294959104  ;;  %v1043_v0 = vld [vmem:[#allocation5 + $0x4] ss:$8 sps:$4 sm:$0xff]   ;;  %v1047_v2 = vld [vmem:[#allocation5] ss:$8 sps:$4 sm:$0xff]   ;;  %v317_v38 = vlaneseq }
  0x5b   : > { %v1045_v1 = vld [vmem:[#allocation5 + $0x104] ss:$8 sps:$4 sm:$0xff]   ;;  %654 = vmatprep.subr.bf16.mxu1 %v1043_v0  ;;  %v1048_v3 = vld [vmem:[#allocation5 + $0x100] ss:$8 sps:$4 sm:$0xff]   ;;  %v1049_v4 = vld [vmem:[#allocation5 + $0x14] ss:$8 sps:$4 sm:$0xff]  }
  0x5c   : > { %695 = vmatprep.subr.bf16.mxu0 %v1045_v1  ;;  %655 = vmatpush1.bf16.msra.mxu1 %v1047_v2  ;;  %v1051_v5 = vld [vmem:[#allocation5 + $0x114] ss:$8 sps:$4 sm:$0xff]   ;;  %v1053_v6 = vld [vmem:[#allocation5 + $0x10] ss:$8 sps:$4 sm:$0xff]   ;;  %v1055_v8 = vld [vmem:[#allocation5 + $0x24] ss:$8 sps:$4 sm:$0xff]  }
  0x5d   : > { %696 = vmatpush1.bf16.msra.mxu0 %v1048_v3  ;;  %656 = vmatprep.subr.bf16.mxu1 %v1049_v4  ;;  %v1054_v7 = vld [vmem:[#allocation5 + $0x110] ss:$8 sps:$4 sm:$0xff]   ;;  %v1057_v9 = vld [vmem:[#allocation5 + $0x124] ss:$8 sps:$4 sm:$0xff]   ;;  %v1059_v10 = vld [vmem:[#allocation5 + $0x20] ss:$8 sps:$4 sm:$0xff]  }
  0x5e   : > { %697 = vmatprep.subr.bf16.mxu0 %v1051_v5  ;;  %v1060_v11 = vld [vmem:[#allocation5 + $0x120] ss:$8 sps:$4 sm:$0xff]   ;;  %v1061_v12 = vld [vmem:[#allocation5 + $0x34] ss:$8 sps:$4 sm:$0xff]   ;;  %v1065_v14 = vld [vmem:[#allocation5 + $0x30] ss:$8 sps:$4 sm:$0xff]  }
  0x5f   : > { %v1063_v13 = vld [vmem:[#allocation5 + $0x134] ss:$8 sps:$4 sm:$0xff]   ;;  %v1066_v15 = vld [vmem:[#allocation5 + $0x130] ss:$8 sps:$4 sm:$0xff]   ;;  %v1067_v16 = vld [vmem:[#allocation5 + $0x44] ss:$8 sps:$4 sm:$0xff]  }
  0x60   : > { %657 = vmatpush1.bf16.msra.mxu1 %v1053_v6  ;;  %v1069_v17 = vld [vmem:[#allocation5 + $0x144] ss:$8 sps:$4 sm:$0xff]   ;;  %v1071_v18 = vld [vmem:[#allocation5 + $0x40] ss:$8 sps:$4 sm:$0xff]   ;;  %v1073_v20 = vld [vmem:[#allocation5 + $0x54] ss:$8 sps:$4 sm:$0xff]  }
  0x61   : > { %698 = vmatpush1.bf16.msra.mxu0 %v1054_v7  ;;  %658 = vmatprep.subr.bf16.mxu1 %v1055_v8  ;;  %v1072_v19 = vld [vmem:[#allocation5 + $0x140] ss:$8 sps:$4 sm:$0xff]   ;;  %v1075_v21 = vld [vmem:[#allocation5 + $0x154] ss:$8 sps:$4 sm:$0xff]   ;;  %v1077_v22 = vld [vmem:[#allocation5 + $0x50] ss:$8 sps:$4 sm:$0xff]  }
  0x62   : > { %699 = vmatprep.subr.bf16.mxu0 %v1057_v9  ;;  %v1078_v23 = vld [vmem:[#allocation5 + $0x150] ss:$8 sps:$4 sm:$0xff]   ;;  %v1079_v24 = vld [vmem:[#allocation5 + $0x64] ss:$8 sps:$4 sm:$0xff]   ;;  %v1083_v26 = vld [vmem:[#allocation5 + $0x60] ss:$8 sps:$4 sm:$0xff]  }
  0x63   : > { %v1081_v25 = vld [vmem:[#allocation5 + $0x164] ss:$8 sps:$4 sm:$0xff]   ;;  %v1084_v27 = vld [vmem:[#allocation5 + $0x160] ss:$8 sps:$4 sm:$0xff]   ;;  %v1085_v28 = vld [vmem:[#allocation5 + $0x74] ss:$8 sps:$4 sm:$0xff]  }
  0x64   : > { %659 = vmatpush1.bf16.msra.mxu1 %v1059_v10  ;;  %v1087_v29 = vld [vmem:[#allocation5 + $0x174] ss:$8 sps:$4 sm:$0xff]   ;;  %v1089_v30 = vld [vmem:[#allocation5 + $0x70] ss:$8 sps:$4 sm:$0xff]   ;;  %v1091_v32 = vld [vmem:[#allocation5 + $0x84] ss:$8 sps:$4 sm:$0xff]  }
  0x65   : > { %700 = vmatpush1.bf16.msra.mxu0 %v1060_v11  ;;  %660 = vmatprep.subr.bf16.mxu1 %v1061_v12  ;;  %v1090_v31 = vld [vmem:[#allocation5 + $0x170] ss:$8 sps:$4 sm:$0xff]   ;;  %v1093_v33 = vld [vmem:[#allocation5 + $0x184] ss:$8 sps:$4 sm:$0xff]   ;;  %v1095_v34 = vld [vmem:[#allocation5 + $0x80] ss:$8 sps:$4 sm:$0xff]  }
  0x66   : > { %701 = vmatprep.subr.bf16.mxu0 %v1063_v13  ;;  %v1096_v35 = vld [vmem:[#allocation5 + $0x180] ss:$8 sps:$4 sm:$0xff]   ;;  %v1290_v36 = vmov 1983009808   ;;  %v1097_v39 = vld [vmem:[#allocation5 + $0x94] ss:$8 sps:$4 sm:$0xff]  }
  0x67   : > { %v315_v37 = vunpack.c.l.s4 %v1290_v36  ;;  %v1099_v40 = vld [vmem:[#allocation5 + $0x194] ss:$8 sps:$4 sm:$0xff]   ;;  %v1101_v41 = vld [vmem:[#allocation5 + $0x90] ss:$8 sps:$4 sm:$0xff]   ;;  %v1482_v43 = vshrl.u32 %v317_v38, 7  ;;  %s964_s21 = sshll.u32 %s1276_s18, 7 }
  0x68   : > { %661 = vmatpush1.bf16.msra.mxu1 %v1065_v14  ;;  %v1102_v44 = vld [vmem:[#allocation5 + $0x190] ss:$8 sps:$4 sm:$0xff]   ;;  %v1103_v45 = vld [vmem:[#allocation5 + $0xa4] ss:$8 sps:$4 sm:$0xff]   ;;  %v1107_v47 = vld [vmem:[#allocation5 + $0xa0] ss:$8 sps:$4 sm:$0xff]   ;;  %s1500_s13 = scalar_lea.hbm %s1553_s4, %s964_s21 }
  0x69   : > { %702 = vmatpush1.bf16.msra.mxu0 %v1066_v15  ;;  %662 = vmatprep.subr.bf16.mxu1 %v1067_v16  ;;  %v316_v42 = vunpack.c.0.s8 %v315_v37  ;;  %v1105_v46 = vld [vmem:[#allocation5 + $0x1a4] ss:$8 sps:$4 sm:$0xff]   ;;  %v1108_v48 = vld [vmem:[#allocation5 + $0x1a0] ss:$8 sps:$4 sm:$0xff]   ;;  %v1109_v50 = vld [vmem:[#allocation5 + $0xb4] ss:$8 sps:$4 sm:$0xff]  }
  0x6a   : > { %703 = vmatprep.subr.bf16.mxu0 %v1069_v17  ;;  %v1111_v51 = vld [vmem:[#allocation5 + $0x1b4] ss:$8 sps:$4 sm:$0xff]   ;;  %v1113_v55 = vld [vmem:[#allocation5 + $0xb0] ss:$8 sps:$4 sm:$0xff]   ;;  %v1115_v57 = vld [vmem:[#allocation5 + $0xc4] ss:$8 sps:$4 sm:$0xff]  }
  0x6b   : > { %v319_v49 = vsub.s32 %v316_v42, %v1482_v43  ;;  %v247_v52 = vld [vmem:[%s1472_s7] sm:$0xff]  ;;  %v1117_v58 = vld [vmem:[#allocation5 + $0x1c4] ss:$8 sps:$4 sm:$0xff]   ;;  %v1119_v62 = vld [vmem:[#allocation5 + $0xc0] ss:$8 sps:$4 sm:$0xff]   ;;  %v740_v12 = vsub.s32 0, %v1482_v43 }
  0x6c   : > { %663 = vmatpush1.bf16.msra.mxu1 %v1071_v18  ;;  %v313_v54 = vcombine.high %v247_v52, %v247_v52  ;;  %v1114_v56 = vld [vmem:[#allocation5 + $0x1b0] ss:$8 sps:$4 sm:$0xff]   ;;  %v1120_v63 = vld [vmem:[#allocation5 + $0x1c0] ss:$8 sps:$4 sm:$0xff]   ;;  %v1121_v0 = vld [vmem:[#allocation5 + $0xd4] ss:$8 sps:$4 sm:$0xff]  }
  0x6d   : > { %704 = vmatpush1.bf16.msra.mxu0 %v1072_v19  ;;  %664 = vmatprep.subr.bf16.mxu1 %v1073_v20  ;;  %v320_v53 = vrot.slane %v247_v52, %v319_v49  ;;  %v1123_v1 = vld [vmem:[#allocation5 + $0x1d4] ss:$8 sps:$4 sm:$0xff]   ;;  %v1125_v2 = vld [vmem:[#allocation5 + $0xd0] ss:$8 sps:$4 sm:$0xff]   ;;  %v1127_v4 = vld [vmem:[#allocation5 + $0xe4] ss:$8 sps:$4 sm:$0xff]  }
  0x6e   : > { %705 = vmatprep.subr.bf16.mxu0 %v1075_v21  ;;  %v327_v60 = vrot.slane %v313_v54, %v319_v49  ;;  %v1126_v3 = vld [vmem:[#allocation5 + $0x1d0] ss:$8 sps:$4 sm:$0xff]   ;;  %v1129_v5 = vld [vmem:[#allocation5 + $0x1e4] ss:$8 sps:$4 sm:$0xff]   ;;  %v1131_v6 = vld [vmem:[#allocation5 + $0xe0] ss:$8 sps:$4 sm:$0xff]  }
  0x6f   : > { %v328_v59 = vcombine.high %v320_v53, %v320_v53  ;;  %v1132_v7 = vld [vmem:[#allocation5 + $0x1e0] ss:$8 sps:$4 sm:$0xff]   ;;  %v1133_v8 = vld [vmem:[#allocation5 + $0xf4] ss:$8 sps:$4 sm:$0xff]   ;;  %v1137_v10 = vld [vmem:[#allocation5 + $0xf0] ss:$8 sps:$4 sm:$0xff]  }
  0x70   : > { %665 = vmatpush1.bf16.msra.mxu1 %v1077_v22  ;;  %v329_v61 = vcombine.high %v327_v60, %v327_v60  ;;  %v1135_v9 = vld [vmem:[#allocation5 + $0x1f4] ss:$8 sps:$4 sm:$0xff]   ;;  %v1138_v11 = vld [vmem:[#allocation5 + $0x1f0] ss:$8 sps:$4 sm:$0xff]   ;;  %v744_v14 = vsub.s32 1, %v1482_v43  ;;  %s246_s22 = scalar_lea.vmem [#allocation7], %s891_s9 }
  0x71   : > { %706 = vmatpush1.bf16.msra.mxu0 %v1078_v23  ;;  %666 = vmatprep.subr.bf16.mxu1 %v1079_v24  ;;  %v736_v13 = vld [vmem:[%s1551_s2] sm:$0x3]  ;;  %s788_s28 = sshll.u32 %s246_s22, 4  ;;  %s772_s24 = scalar_lea.sflag [#allocation4], %s1466_s6  ;;  %s1502_s28 = int_to_ptr.vmem [resolvable:$true] %s788_s28 }
  0x72   : > { %707 = vmatprep.subr.bf16.mxu0 %v1081_v25  ;;  %686 = vmatprep.mubr.bf16.mxu1 %v328_v59  ;;  %v750_v15 = vld [vmem:[%s1552_s3] sm:$0x3]  ;;  %v741_v16 = vrot.slane %v736_v13, %v740_v12  ;;  %v745_v19 = vrot.slane %v736_v13, %v744_v14  ;;  %s1198_s30 = scalar_lea.vmem %s1502_s28, 128  ;;  %s1291_s18 = smov [#allocation7]  }
  0x73   : > { %727 = vmatprep.mubr.bf16.mxu0 %v329_v61  ;;  %v755_v21 = vrot.slane %v750_v15, %v740_v12  ;;  %v759_v25 = vrot.slane %v750_v15, %v744_v14  ;;  %p1199_p4 = scmp.ne.s32.totalorder %s1502_s28, %s1198_s30  ;;  %s1202_s9 = sshll.u32 %s1291_s18, 4  ;;  %s1203_s9 = int_to_ptr.vmem [resolvable:$false] %s1202_s9 }
  0x74   : > { %667 = vmatpush1.bf16.msra.mxu1 %v1083_v26  ;;  %s1204_s11 = scalar_lea.vmem %s1203_s9, 256  ;;  %p1205_p12 = scmp.lt.s32.totalorder %s1502_s28, %s1203_s9 }
  0x75   : > { %708 = vmatpush1.bf16.msra.mxu0 %v1084_v27  ;;  %668 = vmatprep.subr.bf16.mxu1 %v1085_v28  ;;  %p1200_p6 = pnand %p1199_p4, %p1413_p10  ;;  %p1206_p11 = scmp.lt.s32.totalorder %s1204_s11, %s1198_s30 }
  0x76   : > { %709 = vmatprep.subr.bf16.mxu0 %v1087_v29 }
  0x77   : > { %p1201_p8 = pneg %p1200_p6  ;;  %p1207_p0 = por %p1206_p11, %p1205_p12 }
  0x78   : > { %669 = vmatpush1.bf16.msra.mxu1 %v1089_v30 }
  0x79   : > { %710 = vmatpush1.bf16.msra.mxu0 %v1090_v31  ;;  %670 = vmatprep.subr.bf16.mxu1 %v1091_v32  ;;  %p1208_p5 = pnand %p1207_p0, %p1201_p8 }
  0x7a   : > { %711 = vmatprep.subr.bf16.mxu0 %v1093_v33 }
  0x7c   : > { %671 = vmatpush1.bf16.msra.mxu1 %v1095_v34 }
  0x7d   : > { %712 = vmatpush1.bf16.msra.mxu0 %v1096_v35  ;;  %672 = vmatprep.subr.bf16.mxu1 %v1097_v39 }
  0x7e   : > { %713 = vmatprep.subr.bf16.mxu0 %v1099_v40 }
  0x80   : > { %673 = vmatpush1.bf16.msra.mxu1 %v1101_v41 }
  0x81   : > { %714 = vmatpush1.bf16.msra.mxu0 %v1102_v44  ;;  %674 = vmatprep.subr.bf16.mxu1 %v1103_v45 }
  0x82   : > { %715 = vmatprep.subr.bf16.mxu0 %v1105_v46 }
  0x84   : > { %675 = vmatpush1.bf16.msra.mxu1 %v1107_v47 }
  0x85   : > { %716 = vmatpush1.bf16.msra.mxu0 %v1108_v48  ;;  %676 = vmatprep.subr.bf16.mxu1 %v1109_v50 }
  0x86   : > { %717 = vmatprep.subr.bf16.mxu0 %v1111_v51 }
  0x88   : > { %677 = vmatpush1.bf16.msra.mxu1 %v1113_v55 }
  0x89   : > { %718 = vmatpush1.bf16.msra.mxu0 %v1114_v56  ;;  %678 = vmatprep.subr.bf16.mxu1 %v1115_v57 }
  0x8a   : > { %719 = vmatprep.subr.bf16.mxu0 %v1117_v58 }
  0x8c   : > { %679 = vmatpush1.bf16.msra.mxu1 %v1119_v62 }
  0x8d   : > { %720 = vmatpush1.bf16.msra.mxu0 %v1120_v63  ;;  %680 = vmatprep.subr.bf16.mxu1 %v1121_v0 }
  0x8e   : > { %721 = vmatprep.subr.bf16.mxu0 %v1123_v1 }
  0x90   : > { %681 = vmatpush1.bf16.msra.mxu1 %v1125_v2 }
  0x91   : > { %722 = vmatpush1.bf16.msra.mxu0 %v1126_v3  ;;  %682 = vmatprep.subr.bf16.mxu1 %v1127_v4 }
  0x92   : > { %723 = vmatprep.subr.bf16.mxu0 %v1129_v5 }
  0x94   : > { %683 = vmatpush1.bf16.msra.mxu1 %v1131_v6 }
  0x95   : > { %724 = vmatpush1.bf16.msra.mxu0 %v1132_v7  ;;  %684 = vmatprep.subr.bf16.mxu1 %v1133_v8 }
  0x96   : > { %725 = vmatprep.subr.bf16.mxu0 %v1135_v9 }
  0x98   : > { %685 = vmatpush1.bf16.msra.mxu1 %v1137_v10 }
  0x99   : > { %726 = vmatpush1.bf16.msra.mxu0 %v1138_v11 }
  0x9b   : > { %687 = vmatmul.mubr.bf16.vlgmr.msra.gmra.mrb[0].mxu1 %v320_v53 }
  0x9c   : > { %728 = vmatmul.mubr.bf16.vlgmr.msra.gmra.mrb[0].mxu0 %v327_v60 }
 0x16e   : > { %v688_v17 = vpop.f32.mrb[0].mxu1 }
 0x16f   : > { %v729_v18 = vpop.f32.mrb[0].mxu0  ;;  %v690_v22 = vpop.f32.mrb[1].mxu1 }
 0x170   : > { %v730_v20 = vadd.f32 %v729_v18, %v688_v17  ;;  %v731_v23 = vpop.f32.mrb[1].mxu0  ;;  %v692_v26 = vpop.f32.mrb[2].mxu1 }
 0x171   : > { %v732_v24 = vadd.f32 %v731_v23, %v690_v22  ;;  %v733_v27 = vpop.f32.mrb[2].mxu0  ;;  %v693_v29 = vpop.f32.mrb[3].mxu1 }
 0x172   : > { %v748_v28 = vmul.f32 %v741_v16, %v730_v20  ;;  %v734_v30 = vpop.f32.mrb[3].mxu0 }
 0x173   : > { %v749_v31 = vmul.f32 %v745_v19, %v732_v24 }
 0x174   : > { %v762_v32 = vadd.f32 %v755_v21, %v748_v28 }
 0x175   : > { %v763_v33 = vadd.f32 %v759_v25, %v749_v31 }
 0x176   : > { %v764_v34 = vmax.f32 %v762_v32, 0.0 }
 0x177   : > { %v765_v35 = vmax.f32 %v763_v33, 0.0 }
 0x179   : > { %v768_v36 = vcombine.low %v764_v34, %v765_v35 }
 0x17b   : > { %770 = vst [vmem:[%s246_s22] sm:$0xff] %v768_v36 }
 0x17c   : > { %1211 = shalt.err (!%p1208_p5)
}
 0x17d   : > { %s1212_s6 = scalar_lea.hbm %s1500_s13, 128  ;;  %s1216_s25 = scalar_lea.hbm %s1553_s4, 256 }
 0x17e   : > { %p1213_p9 = scmp.ne.s32.totalorder %s1500_s13, %s1212_s6  ;;  %p1217_p7 = scmp.lt.u32.totalorder %s1500_s13, %s1553_s4 }
 0x17f   : > { %p1218_p3 = scmp.lt.u32.totalorder %s1216_s25, %s1212_s6  ;;  %p1220_p4 = scmp.lt.u32.totalorder %s1212_s6, %s1500_s13 }
 0x180   : > { %p1214_p1 = pnand %p1213_p9, %p1413_p10 }
 0x181   : > { %p1219_p13 = por %p1218_p3, %p1217_p7 }
 0x182   : > { %p1215_p2 = pneg %p1214_p1 }
 0x183   : > { %p1221_p6 = por %p1220_p4, %p1219_p13 }
 0x185   : > { %p1222_p8 = pnand %p1221_p6, %p1215_p2 }
 0x187   : > { %1225 = shalt.err (!%p1222_p8)
}
 0x188   : > { %973 = dma.vmem_to_hbm [thread:$0]  (%p1413_p10), %s1502_s28, 128, %s1500_s13, %s772_s24  }
 0x189 PF: > { %s800_s21 = sand.u32 1, %s1264_s15   ;;  %p1571_p12 = scmp.ne.s32.totalorder %s1561_s26, 0 }
 0x18a   : > { %p1572_p11 = scmp.ge.s32.totalorder %s1284_s20, 2  ;;  %s801_s22 = scalar_lea.sflag [#allocation4], %s800_s21 }
 0x18c   : > { %p984_p0 = pnand %p1572_p11, %p1571_p12 }
 0x18e   : > { %1259 = dma.done.wait (!%p984_p0), %s801_s22, 128  }
 0x18f   : > { %1261 = vsyncadd (!%p984_p0), %s801_s22, 4294967168  ;;  %s21_s20 = sadd.s32 1, %s1284_s20   ;;  %s1573_s15 = smov %s1268_s16 }
 0x190   : > { %p18_p5 = scmp.ge.s32.totalorder %s21_s20, 4   ;;  %s1574_s16 = smov %s1272_s17 }
 0x191   : > { %s1575_s17 = smov %s1422_s10  ;;  %s1576_s18 = smov %s1280_s19 }
 0x192   : > { %s1577_s19 = smov %s1579_s5  ;;  %20 = sbr.rel (!%p18_p5) target bundleno = 7 (0x7), region = 85 }
 0x199   :  { %806 = vsyncpa [#allocation3], 1 }
 0x19a   :  { %808 = vsyncpa [#allocation3 + $0x1], 1 }
 0x19b   :  { %809 = vsyncpa [#allocation6], 1 }
 0x19c   :  { %810 = vsyncpa [#allocation4], 1 }
 0x19d   :  { %812 = vsyncpa [#allocation4 + $0x1], 1 }

</bundles_post_ra>
